<compile_context>
chip_gen: v5e
topology: v5e:2x2
jax: 0.10.0
libtpu: 0.0.40
codegen_flags: <defaults>
</compile_context>

<pallas_src>
import jax
import jax.numpy as jnp
from jax.experimental import pallas as pl
from jax.experimental.pallas import tpu as pltpu

_BLOCK_BYTES = 2 * 1024 * 1024   # ~2 MiB per stream per block (double-buffered)


def _add_relu_kernel(a_ref, b_ref, o_ref):
    # Fused elementwise add + ReLU on the current VMEM tile (VPU only).
    o_ref[...] = jnp.maximum(a_ref[...] + b_ref[...], 0.0)


def _as_2d(x):
    """Collapse x (contiguous) to a 2-D slab with no data movement.

    Prefers a lane-dense last dim (large multiple of 128) when the element
    count allows it; otherwise collapses trailing spatial dims
    (NCHW -> (N*C, H*W)) and accepts masked lane stores instead of padding.
    """
    total = x.size
    for lane in (2048, 1024, 512, 256, 128):
        if total % lane == 0:
            return x.reshape(total // lane, lane)
    if x.ndim >= 2:
        cols = x.shape[-1] if x.ndim == 2 else x.shape[-2] * x.shape[-1]
        return x.reshape(total // cols, cols)
    return x.reshape(1, total)


def _pick_tm(rows, cols, itemsize):
    """Rows per block: multiple of 8 (or full extent), divides `rows`,
    <= ~2 MiB per stream, and >= 2 grid steps when possible (v7x megacore)."""
    if rows <= 8:
        return rows
    max_rows = max(8, _BLOCK_BYTES // max(1, cols * itemsize))
    # Prefer at least 2 grid steps so dimension_semantics=("parallel",) can
    # shard work across v7x's two TensorCores and hide per-step ramp.
    limit = min(max_rows, max(8, rows // 2))
    limit = max(8, (limit // 8) * 8)
    for tm in range(limit, 7, -8):
        if rows % tm == 0:
            return tm
    # No multiple-of-8 divisor below the budget: single full-extent block
    # (legal regardless of the (8,128) rule).
    # TODO(synk): extremely large `rows` with no 8-aligned divisor would blow
    # VMEM here; not reachable for the shapes this module uses.
    return rows


def add_relu(x, y):
    """relu(x + y) for arbitrary contiguous tensors via a tiled Pallas kernel."""
    assert x.shape == y.shape and x.dtype == y.dtype
    orig_shape = x.shape
    total = x.size
    itemsize = jnp.dtype(x.dtype).itemsize

    x2 = _as_2d(x)
    y2 = _as_2d(y)
    rows, cols = x2.shape
    tm = _pick_tm(rows, cols, itemsize)
    grid = (rows // tm,)

    out2 = pl.pallas_call(
        _add_relu_kernel,
        out_shape=jax.ShapeDtypeStruct((rows, cols), x.dtype),
        grid=grid,
        in_specs=[
            pl.BlockSpec((tm, cols), lambda i: (i, 0)),
            pl.BlockSpec((tm, cols), lambda i: (i, 0)),
        ],
        out_specs=pl.BlockSpec((tm, cols), lambda i: (i, 0)),
        compiler_params=pltpu.CompilerParams(
            dimension_semantics=("parallel",),
            # Working set: 3 streams x 2 buffers x <=2 MiB ~= 12 MiB, under
            # every generation's scoped-VMEM default -> no vmem_limit_bytes.
        ),
        cost_estimate=pl.CostEstimate(
            flops=2 * total,
            transcendentals=0,
            bytes_accessed=3 * total * itemsize,
        ),
    )(x2, y2)

    return out2.reshape(orig_shape)


if __name__ == "__main__":
    key = jax.random.PRNGKey(0)
    k1, k2 = jax.random.split(key)

    # Shape from the original module: (1, 720, 14, 14) NCHW. 720*14*14 is not
    # a multiple of 128, so this exercises the pad-free (N*C, H*W) collapse
    # with a 2-step grid of (360, 196) blocks.
    shape = (1, 720, 14, 14)
    x179 = jax.random.normal(k1, shape, dtype=jnp.float32)
    x187 = jax.random.normal(k2, shape, dtype=jnp.float32)

    out = add_relu(x179, x187)
    jax.block_until_ready(out)
    ref = jnp.maximum(x179 + x187, 0.0)
    assert out.shape == shape
    assert jnp.allclose(out, ref), "mismatch vs reference (unaligned path)"

    # Small lane-aligned shape exercising the lane-dense path.
    shape2 = (2, 4, 16, 16)
    a = jax.random.normal(k1, shape2, dtype=jnp.float32)
    b = jax.random.normal(k2, shape2, dtype=jnp.float32)
    out2 = add_relu(a, b)
    jax.block_until_ready(out2)
    assert jnp.allclose(out2, jnp.maximum(a + b, 0.0)), "mismatch (aligned path)"

    print("KERNEL_OK")
</pallas_src>

<mosaic_0001>
module attributes {stable_mosaic.version = 11 : i64} {
  func.func @_add_relu_kernel(%arg0: i32, %arg1: memref<360x196xf32, #tpu.memory_space<vmem>>, %arg2: memref<360x196xf32, #tpu.memory_space<vmem>>, %arg3: memref<360x196xf32, #tpu.memory_space<vmem>>) attributes {dimension_semantics = [#tpu.dimension_semantics<parallel>], iteration_bounds = array<i64: 2>, scalar_prefetch = 0 : i64, scratch_operands = 0 : i64, tpu.core_type = #tpu.core_type<tc>, window_params = [{transform_indices = @transform_0, window_bounds = array<i64: 360, 196>}, {transform_indices = @transform_1, window_bounds = array<i64: 360, 196>}, {transform_indices = @transform_2, window_bounds = array<i64: 360, 196>}]} {
    %c0 = arith.constant 0 : index
    %c0_0 = arith.constant 0 : index
    %0 = vector.load %arg1[%c0, %c0_0] : memref<360x196xf32, #tpu.memory_space<vmem>>, vector<360x196xf32>
    %c0_1 = arith.constant 0 : index
    %c0_2 = arith.constant 0 : index
    %1 = vector.load %arg2[%c0_1, %c0_2] : memref<360x196xf32, #tpu.memory_space<vmem>>, vector<360x196xf32>
    %2 = arith.addf %0, %1 : vector<360x196xf32>
    %cst = arith.constant 0.000000e+00 : f32
    %3 = vector.broadcast %cst : f32 to vector<360x196xf32>
    %4 = arith.maximumf %2, %3 : vector<360x196xf32>
    %c0_3 = arith.constant 0 : index
    %c0_4 = arith.constant 0 : index
    %5 = vector.load %arg3[%c0_3, %c0_4] : memref<360x196xf32, #tpu.memory_space<vmem>>, vector<360x196xf32>
    tpu.vector_store %arg3[%c0_3, %c0_4], %4 {strides = array<i32>} : memref<360x196xf32, #tpu.memory_space<vmem>>, vector<360x196xf32>,
    return
  }
  func.func @transform_0(%arg0: i32) -> (i32, i32) {
    %c0_i32 = arith.constant 0 : i32
    %c0_i32_0 = arith.constant 0 : i32
    return %arg0, %c0_i32 : i32, i32
  }
  func.func @transform_1(%arg0: i32) -> (i32, i32) {
    %c0_i32 = arith.constant 0 : i32
    %c0_i32_0 = arith.constant 0 : i32
    return %arg0, %c0_i32 : i32, i32
  }
  func.func @transform_2(%arg0: i32) -> (i32, i32) {
    %c0_i32 = arith.constant 0 : i32
    %c0_i32_0 = arith.constant 0 : i32
    return %arg0, %c0_i32 : i32, i32
  }
}

</mosaic_0001>

<bundles_post_ra>
// kernel: tpu_custom_call.1
= control target key start
LH: loop header
LB: loop body
LE: loop exit
PB: predicated region body
PF: predicated region fallthrough
CT: control target
= control target key end

     0   :  { %s745_s9 = smov 0   ;;  %s1203_s0 = inlined_call_operand.vmem [shape: f32[720,196], index: 0, kind: input, shape index: {}]   ;;  %s1204_s1 = inlined_call_operand.vmem [shape: f32[720,196], index: 1, kind: input, shape index: {}]   ;;  %s1205_s2 = inlined_call_operand.vmem [shape: f32[720,196], index: 2, kind: output, shape index: {}]  }
   0x1 LB: > { %s698_s10 = sadd.s32 4294967295, %s728_s9   ;;  %p702_p0 = scmp.ge.s32.totalorder %s728_s9, 1  ;;  %s728_s9 = sphi %s745_s9, %s12_s9  }
   0x2   : > { %p126_p1 = scmp.lt.s32.totalorder %s728_s9, 3 }
   0x4   : > { %p127_p2 = pnand %p702_p0, %p126_p1 }
   0x5   : > { %s156_s11 = smul.u32 (!%p127_p2), 45, %s698_s10 }
   0x6   : > { %130 = sbr.rel (%p127_p2) target bundleno = 110 (0x6e), region = 28 }
   0x7   : > { %p157_p3 = scmp.lt.s32.totalorder (!%p127_p2), %s156_s11, 89 }
   0xb   : > { %s1207_s11 = smov (!%p157_p3, %s156_s11), 89  ;;  %vm538_vm0 = vcmask 556032  }
   0xc   : > { %s711_s12 = sshll.u32 %s1207_s11, 4 }
   0xd   : > { %s756_s15 = scalar_lea.vmem %s1203_s0, %s711_s12  ;;  %s761_s18 = scalar_lea.vmem %s1204_s1, %s711_s12 }
   0xe   : > { %v177_v0 = vld [vmem:[%s756_s15] sm:$0xff]  ;;  %v178_v2 = vld [vmem:[%s756_s15 + $0x8] sm:$0xff]  ;;  %v179_v5 = vld [vmem:[%s756_s15 + $0x10] sm:$0xff]  ;;  %s772_s21 = scalar_lea.vmem %s1205_s2, %s711_s12 }
   0xf   : > { %v267_v1 = vld [vmem:[%s761_s18] sm:$0xff]  ;;  %v268_v4 = vld [vmem:[%s761_s18 + $0x8] sm:$0xff]  ;;  %v269_v6 = vld [vmem:[%s761_s18 + $0x10] sm:$0xff] }
  0x10   : > { %v357_v3 = vadd.f32 %v267_v1, %v177_v0  ;;  %v358_v7 = vadd.f32 %v268_v4, %v178_v2  ;;  %v359_v8 = vadd.f32 %v269_v6, %v179_v5  ;;  %v180_v9 = vld [vmem:[%s756_s15 + $0x18] sm:$0xff]  ;;  %v181_v11 = vld [vmem:[%s756_s15 + $0x20] sm:$0xff]  ;;  %v182_v15 = vld [vmem:[%s756_s15 + $0x28] sm:$0xff] }
  0x11   : > { %v270_v10 = vld [vmem:[%s761_s18 + $0x18] sm:$0xff]  ;;  %v271_v14 = vld [vmem:[%s761_s18 + $0x20] sm:$0xff]  ;;  %v272_v16 = vld [vmem:[%s761_s18 + $0x28] sm:$0xff] }
  0x12   : > { %v447_v12 = vmax.f32 %v357_v3, 0.0  ;;  %v360_v13 = vadd.f32 %v270_v10, %v180_v9  ;;  %v448_v17 = vmax.f32 %v358_v7, 0.0  ;;  %v449_v18 = vmax.f32 %v359_v8, 0.0  ;;  %v183_v21 = vld [vmem:[%s756_s15 + $0x30] sm:$0xff]  ;;  %v184_v23 = vld [vmem:[%s756_s15 + $0x38] sm:$0xff]  ;;  %v185_v27 = vld [vmem:[%s756_s15 + $0x40] sm:$0xff] }
  0x13   : > { %v361_v19 = vadd.f32 %v271_v14, %v181_v11  ;;  %v362_v20 = vadd.f32 %v272_v16, %v182_v15  ;;  %v273_v22 = vld [vmem:[%s761_s18 + $0x30] sm:$0xff]  ;;  %v274_v26 = vld [vmem:[%s761_s18 + $0x38] sm:$0xff]  ;;  %v275_v28 = vld [vmem:[%s761_s18 + $0x40] sm:$0xff] }
  0x14   : > { %537 = vst [vmem:[%s772_s21] sm:$0xff] %v447_v12  ;;  %v450_v24 = vmax.f32 %v360_v13, 0.0  ;;  %v363_v25 = vadd.f32 %v273_v22, %v183_v21  ;;  %v364_v31 = vadd.f32 %v274_v26, %v184_v23  ;;  %v365_v32 = vadd.f32 %v275_v28, %v185_v27  ;;  %v186_v33 = vld [vmem:[%s756_s15 + $0x48] sm:$0xff]  ;;  %v187_v35 = vld [vmem:[%s756_s15 + $0x50] sm:$0xff]  ;;  %v188_v39 = vld [vmem:[%s756_s15 + $0x58] sm:$0xff] }
  0x15   : > { %539 = vst.msk [vmem:[%s772_s21 + $0x8] sm:$0xff] %vm538_vm0, %v448_v17  ;;  %v451_v29 = vmax.f32 %v361_v19, 0.0  ;;  %v452_v30 = vmax.f32 %v362_v20, 0.0  ;;  %v276_v34 = vld [vmem:[%s761_s18 + $0x48] sm:$0xff]  ;;  %v277_v38 = vld [vmem:[%s761_s18 + $0x50] sm:$0xff]  ;;  %v278_v40 = vld [vmem:[%s761_s18 + $0x58] sm:$0xff] }
  0x16   : > { %540 = vst [vmem:[%s772_s21 + $0x10] sm:$0xff] %v449_v18  ;;  %v453_v36 = vmax.f32 %v363_v25, 0.0  ;;  %v366_v37 = vadd.f32 %v276_v34, %v186_v33  ;;  %v454_v41 = vmax.f32 %v364_v31, 0.0  ;;  %v367_v42 = vadd.f32 %v277_v38, %v187_v35  ;;  %v189_v44 = vld [vmem:[%s756_s15 + $0x60] sm:$0xff]  ;;  %v190_v46 = vld [vmem:[%s756_s15 + $0x68] sm:$0xff]  ;;  %v191_v50 = vld [vmem:[%s756_s15 + $0x70] sm:$0xff] }
  0x17   : > { %541 = vst.msk [vmem:[%s772_s21 + $0x18] sm:$0xff] %vm538_vm0, %v450_v24  ;;  %v368_v43 = vadd.f32 %v278_v40, %v188_v39  ;;  %v279_v45 = vld [vmem:[%s761_s18 + $0x60] sm:$0xff]  ;;  %v455_v47 = vmax.f32 %v365_v32, 0.0  ;;  %v280_v49 = vld [vmem:[%s761_s18 + $0x68] sm:$0xff]  ;;  %v281_v51 = vld [vmem:[%s761_s18 + $0x70] sm:$0xff] }
  0x18   : > { %542 = vst [vmem:[%s772_s21 + $0x20] sm:$0xff] %v451_v29  ;;  %v369_v48 = vadd.f32 %v279_v45, %v189_v44  ;;  %v456_v52 = vmax.f32 %v366_v37, 0.0  ;;  %v370_v53 = vadd.f32 %v280_v49, %v190_v46  ;;  %v192_v54 = vld [vmem:[%s756_s15 + $0x78] sm:$0xff]  ;;  %v193_v56 = vld [vmem:[%s756_s15 + $0x80] sm:$0xff]  ;;  %v457_v57 = vmax.f32 %v367_v42, 0.0  ;;  %v194_v60 = vld [vmem:[%s756_s15 + $0x88] sm:$0xff] }
  0x19   : > { %543 = vst.msk [vmem:[%s772_s21 + $0x28] sm:$0xff] %vm538_vm0, %v452_v30  ;;  %v282_v55 = vld [vmem:[%s761_s18 + $0x78] sm:$0xff]  ;;  %v371_v58 = vadd.f32 %v281_v51, %v191_v50  ;;  %v283_v59 = vld [vmem:[%s761_s18 + $0x80] sm:$0xff]  ;;  %v284_v61 = vld [vmem:[%s761_s18 + $0x88] sm:$0xff]  ;;  %v458_v62 = vmax.f32 %v368_v43, 0.0 }
  0x1a   : > { %544 = vst [vmem:[%s772_s21 + $0x30] sm:$0xff] %v453_v36  ;;  %v372_v63 = vadd.f32 %v282_v55, %v192_v54  ;;  %v195_v0 = vld [vmem:[%s756_s15 + $0x90] sm:$0xff]  ;;  %v459_v2 = vmax.f32 %v369_v48, 0.0  ;;  %v373_v3 = vadd.f32 %v283_v59, %v193_v56  ;;  %v196_v4 = vld [vmem:[%s756_s15 + $0x98] sm:$0xff]  ;;  %v460_v6 = vmax.f32 %v370_v53, 0.0  ;;  %v197_v8 = vld [vmem:[%s756_s15 + $0xa0] sm:$0xff] }
  0x1b   : > { %545 = vst.msk [vmem:[%s772_s21 + $0x38] sm:$0xff] %vm538_vm0, %v454_v41  ;;  %v285_v1 = vld [vmem:[%s761_s18 + $0x90] sm:$0xff]  ;;  %v286_v5 = vld [vmem:[%s761_s18 + $0x98] sm:$0xff]  ;;  %v374_v7 = vadd.f32 %v284_v61, %v194_v60  ;;  %v287_v9 = vld [vmem:[%s761_s18 + $0xa0] sm:$0xff]  ;;  %v461_v10 = vmax.f32 %v371_v58, 0.0 }
  0x1c   : > { %546 = vst [vmem:[%s772_s21 + $0x40] sm:$0xff] %v455_v47  ;;  %v375_v11 = vadd.f32 %v285_v1, %v195_v0  ;;  %v198_v12 = vld [vmem:[%s756_s15 + $0xa8] sm:$0xff]  ;;  %v462_v14 = vmax.f32 %v372_v63, 0.0  ;;  %v376_v15 = vadd.f32 %v286_v5, %v196_v4  ;;  %v199_v16 = vld [vmem:[%s756_s15 + $0xb0] sm:$0xff]  ;;  %v463_v18 = vmax.f32 %v373_v3, 0.0  ;;  %v200_v20 = vld [vmem:[%s756_s15 + $0xb8] sm:$0xff] }
  0x1d   : > { %547 = vst.msk [vmem:[%s772_s21 + $0x48] sm:$0xff] %vm538_vm0, %v456_v52  ;;  %v288_v13 = vld [vmem:[%s761_s18 + $0xa8] sm:$0xff]  ;;  %v289_v17 = vld [vmem:[%s761_s18 + $0xb0] sm:$0xff]  ;;  %v377_v19 = vadd.f32 %v287_v9, %v197_v8  ;;  %v290_v21 = vld [vmem:[%s761_s18 + $0xb8] sm:$0xff]  ;;  %v464_v22 = vmax.f32 %v374_v7, 0.0 }
  0x1e   : > { %548 = vst [vmem:[%s772_s21 + $0x50] sm:$0xff] %v457_v57  ;;  %v378_v23 = vadd.f32 %v288_v13, %v198_v12  ;;  %v201_v24 = vld [vmem:[%s756_s15 + $0xc0] sm:$0xff]  ;;  %v465_v26 = vmax.f32 %v375_v11, 0.0  ;;  %v379_v27 = vadd.f32 %v289_v17, %v199_v16  ;;  %v202_v28 = vld [vmem:[%s756_s15 + $0xc8] sm:$0xff]  ;;  %v466_v30 = vmax.f32 %v376_v15, 0.0  ;;  %v203_v32 = vld [vmem:[%s756_s15 + $0xd0] sm:$0xff] }
  0x1f   : > { %549 = vst.msk [vmem:[%s772_s21 + $0x58] sm:$0xff] %vm538_vm0, %v458_v62  ;;  %v291_v25 = vld [vmem:[%s761_s18 + $0xc0] sm:$0xff]  ;;  %v292_v29 = vld [vmem:[%s761_s18 + $0xc8] sm:$0xff]  ;;  %v380_v31 = vadd.f32 %v290_v21, %v200_v20  ;;  %v293_v33 = vld [vmem:[%s761_s18 + $0xd0] sm:$0xff]  ;;  %v467_v34 = vmax.f32 %v377_v19, 0.0 }
  0x20   : > { %550 = vst [vmem:[%s772_s21 + $0x60] sm:$0xff] %v459_v2  ;;  %v381_v35 = vadd.f32 %v291_v25, %v201_v24  ;;  %v204_v36 = vld [vmem:[%s756_s15 + $0xd8] sm:$0xff]  ;;  %v468_v38 = vmax.f32 %v378_v23, 0.0  ;;  %v382_v39 = vadd.f32 %v292_v29, %v202_v28  ;;  %v205_v40 = vld [vmem:[%s756_s15 + $0xe0] sm:$0xff]  ;;  %v469_v42 = vmax.f32 %v379_v27, 0.0  ;;  %v206_v44 = vld [vmem:[%s756_s15 + $0xe8] sm:$0xff] }
  0x21   : > { %551 = vst.msk [vmem:[%s772_s21 + $0x68] sm:$0xff] %vm538_vm0, %v460_v6  ;;  %v294_v37 = vld [vmem:[%s761_s18 + $0xd8] sm:$0xff]  ;;  %v295_v41 = vld [vmem:[%s761_s18 + $0xe0] sm:$0xff]  ;;  %v383_v43 = vadd.f32 %v293_v33, %v203_v32  ;;  %v296_v45 = vld [vmem:[%s761_s18 + $0xe8] sm:$0xff]  ;;  %v470_v46 = vmax.f32 %v380_v31, 0.0 }
  0x22   : > { %552 = vst [vmem:[%s772_s21 + $0x70] sm:$0xff] %v461_v10  ;;  %v384_v47 = vadd.f32 %v294_v37, %v204_v36  ;;  %v207_v48 = vld [vmem:[%s756_s15 + $0xf0] sm:$0xff]  ;;  %v471_v50 = vmax.f32 %v381_v35, 0.0  ;;  %v385_v51 = vadd.f32 %v295_v41, %v205_v40  ;;  %v208_v52 = vld [vmem:[%s756_s15 + $0xf8] sm:$0xff]  ;;  %v472_v54 = vmax.f32 %v382_v39, 0.0  ;;  %v209_v56 = vld [vmem:[%s756_s15 + $0x100] sm:$0xff] }
  0x23   : > { %553 = vst.msk [vmem:[%s772_s21 + $0x78] sm:$0xff] %vm538_vm0, %v462_v14  ;;  %v297_v49 = vld [vmem:[%s761_s18 + $0xf0] sm:$0xff]  ;;  %v298_v53 = vld [vmem:[%s761_s18 + $0xf8] sm:$0xff]  ;;  %v386_v55 = vadd.f32 %v296_v45, %v206_v44  ;;  %v299_v57 = vld [vmem:[%s761_s18 + $0x100] sm:$0xff]  ;;  %v473_v58 = vmax.f32 %v383_v43, 0.0 }
  0x24   : > { %554 = vst [vmem:[%s772_s21 + $0x80] sm:$0xff] %v463_v18  ;;  %v387_v59 = vadd.f32 %v297_v49, %v207_v48  ;;  %v210_v60 = vld [vmem:[%s756_s15 + $0x108] sm:$0xff]  ;;  %v474_v62 = vmax.f32 %v384_v47, 0.0  ;;  %v388_v63 = vadd.f32 %v298_v53, %v208_v52  ;;  %v211_v0 = vld [vmem:[%s756_s15 + $0x110] sm:$0xff]  ;;  %v475_v2 = vmax.f32 %v385_v51, 0.0  ;;  %v212_v4 = vld [vmem:[%s756_s15 + $0x118] sm:$0xff] }
  0x25   : > { %555 = vst.msk [vmem:[%s772_s21 + $0x88] sm:$0xff] %vm538_vm0, %v464_v22  ;;  %v300_v61 = vld [vmem:[%s761_s18 + $0x108] sm:$0xff]  ;;  %v301_v1 = vld [vmem:[%s761_s18 + $0x110] sm:$0xff]  ;;  %v389_v3 = vadd.f32 %v299_v57, %v209_v56  ;;  %v302_v5 = vld [vmem:[%s761_s18 + $0x118] sm:$0xff]  ;;  %v476_v6 = vmax.f32 %v386_v55, 0.0 }
  0x26   : > { %556 = vst [vmem:[%s772_s21 + $0x90] sm:$0xff] %v465_v26  ;;  %v390_v7 = vadd.f32 %v300_v61, %v210_v60  ;;  %v213_v8 = vld [vmem:[%s756_s15 + $0x120] sm:$0xff]  ;;  %v477_v10 = vmax.f32 %v387_v59, 0.0  ;;  %v391_v11 = vadd.f32 %v301_v1, %v211_v0  ;;  %v214_v12 = vld [vmem:[%s756_s15 + $0x128] sm:$0xff]  ;;  %v478_v14 = vmax.f32 %v388_v63, 0.0  ;;  %v215_v16 = vld [vmem:[%s756_s15 + $0x130] sm:$0xff] }
  0x27   : > { %557 = vst.msk [vmem:[%s772_s21 + $0x98] sm:$0xff] %vm538_vm0, %v466_v30  ;;  %v303_v9 = vld [vmem:[%s761_s18 + $0x120] sm:$0xff]  ;;  %v304_v13 = vld [vmem:[%s761_s18 + $0x128] sm:$0xff]  ;;  %v392_v15 = vadd.f32 %v302_v5, %v212_v4  ;;  %v305_v17 = vld [vmem:[%s761_s18 + $0x130] sm:$0xff]  ;;  %v479_v18 = vmax.f32 %v389_v3, 0.0 }
  0x28   : > { %558 = vst [vmem:[%s772_s21 + $0xa0] sm:$0xff] %v467_v34  ;;  %v393_v19 = vadd.f32 %v303_v9, %v213_v8  ;;  %v216_v20 = vld [vmem:[%s756_s15 + $0x138] sm:$0xff]  ;;  %v480_v22 = vmax.f32 %v390_v7, 0.0  ;;  %v394_v23 = vadd.f32 %v304_v13, %v214_v12  ;;  %v217_v24 = vld [vmem:[%s756_s15 + $0x140] sm:$0xff]  ;;  %v481_v26 = vmax.f32 %v391_v11, 0.0  ;;  %v218_v28 = vld [vmem:[%s756_s15 + $0x148] sm:$0xff] }
  0x29   : > { %559 = vst.msk [vmem:[%s772_s21 + $0xa8] sm:$0xff] %vm538_vm0, %v468_v38  ;;  %v306_v21 = vld [vmem:[%s761_s18 + $0x138] sm:$0xff]  ;;  %v307_v25 = vld [vmem:[%s761_s18 + $0x140] sm:$0xff]  ;;  %v395_v27 = vadd.f32 %v305_v17, %v215_v16  ;;  %v308_v29 = vld [vmem:[%s761_s18 + $0x148] sm:$0xff]  ;;  %v482_v30 = vmax.f32 %v392_v15, 0.0 }
  0x2a   : > { %560 = vst [vmem:[%s772_s21 + $0xb0] sm:$0xff] %v469_v42  ;;  %v396_v31 = vadd.f32 %v306_v21, %v216_v20  ;;  %v219_v32 = vld [vmem:[%s756_s15 + $0x150] sm:$0xff]  ;;  %v483_v34 = vmax.f32 %v393_v19, 0.0  ;;  %v397_v35 = vadd.f32 %v307_v25, %v217_v24  ;;  %v220_v36 = vld [vmem:[%s756_s15 + $0x158] sm:$0xff]  ;;  %v484_v38 = vmax.f32 %v394_v23, 0.0  ;;  %v221_v40 = vld [vmem:[%s756_s15 + $0x160] sm:$0xff] }
  0x2b   : > { %561 = vst.msk [vmem:[%s772_s21 + $0xb8] sm:$0xff] %vm538_vm0, %v470_v46  ;;  %v309_v33 = vld [vmem:[%s761_s18 + $0x150] sm:$0xff]  ;;  %v310_v37 = vld [vmem:[%s761_s18 + $0x158] sm:$0xff]  ;;  %v398_v39 = vadd.f32 %v308_v29, %v218_v28  ;;  %v311_v41 = vld [vmem:[%s761_s18 + $0x160] sm:$0xff]  ;;  %v485_v43 = vmax.f32 %v395_v27, 0.0 }
  0x2c   : > { %562 = vst [vmem:[%s772_s21 + $0xc0] sm:$0xff] %v471_v50  ;;  %v222_v42 = vld [vmem:[%s756_s15 + $0x168] sm:$0xff]  ;;  %v399_v44 = vadd.f32 %v309_v33, %v219_v32  ;;  %v223_v46 = vld [vmem:[%s756_s15 + $0x170] sm:$0xff]  ;;  %v486_v48 = vmax.f32 %v396_v31, 0.0  ;;  %v916_v49 = vadd.f32 %v310_v37, %v220_v36  ;;  %v224_v50 = vld [vmem:[%s756_s15 + $0x178] sm:$0xff]  ;;  %v487_v53 = vmax.f32 %v397_v35, 0.0 }
  0x2d   : > { %563 = vst.msk [vmem:[%s772_s21 + $0xc8] sm:$0xff] %vm538_vm0, %v472_v54  ;;  %v312_v45 = vld [vmem:[%s761_s18 + $0x168] sm:$0xff]  ;;  %v313_v47 = vld [vmem:[%s761_s18 + $0x170] sm:$0xff]  ;;  %v314_v51 = vld [vmem:[%s761_s18 + $0x178] sm:$0xff]  ;;  %v922_v54 = vadd.f32 %v311_v41, %v221_v40 }
  0x2e   : > { %564 = vst [vmem:[%s772_s21 + $0xd0] sm:$0xff] %v473_v58  ;;  %v225_v52 = vld [vmem:[%s756_s15 + $0x180] sm:$0xff]  ;;  %v226_v56 = vld [vmem:[%s756_s15 + $0x188] sm:$0xff]  ;;  %v488_v58 = vmax.f32 %v398_v39, 0.0  ;;  %v929_v59 = vadd.f32 %v312_v45, %v222_v42  ;;  %v227_v60 = vld [vmem:[%s756_s15 + $0x190] sm:$0xff]  ;;  %v489_v63 = vmax.f32 %v399_v44, 0.0  ;;  %v935_v0 = vadd.f32 %v313_v47, %v223_v46 }
  0x2f   : > { %565 = vst.msk [vmem:[%s772_s21 + $0xd8] sm:$0xff] %vm538_vm0, %v474_v62  ;;  %v315_v55 = vld [vmem:[%s761_s18 + $0x180] sm:$0xff]  ;;  %v316_v57 = vld [vmem:[%s761_s18 + $0x188] sm:$0xff]  ;;  %v317_v61 = vld [vmem:[%s761_s18 + $0x190] sm:$0xff]  ;;  %v945_v7 = vadd.f32 %v314_v51, %v224_v50  ;;  %v491_v15 = vmax.f32 %v922_v54, 0.0 }
  0x30   : > { %566 = vst [vmem:[%s772_s21 + $0xe0] sm:$0xff] %v475_v2  ;;  %v241_v62 = vld [vmem:[%s756_s15 + $0x200] sm:$0xff]  ;;  %v228_v1 = vld [vmem:[%s756_s15 + $0x198] sm:$0xff]  ;;  %v242_v4 = vld [vmem:[%s756_s15 + $0x208] sm:$0xff]  ;;  %v958_v16 = vadd.f32 %v315_v55, %v225_v52  ;;  %v492_v23 = vmax.f32 %v929_v59, 0.0  ;;  %v970_v24 = vadd.f32 %v316_v57, %v226_v56  ;;  %v493_v32 = vmax.f32 %v935_v0, 0.0 }
  0x31   : > { %567 = vst.msk [vmem:[%s772_s21 + $0xe8] sm:$0xff] %vm538_vm0, %v476_v6  ;;  %v318_v2 = vld [vmem:[%s761_s18 + $0x198] sm:$0xff]  ;;  %v331_v3 = vld [vmem:[%s761_s18 + $0x200] sm:$0xff]  ;;  %v332_v5 = vld [vmem:[%s761_s18 + $0x208] sm:$0xff]  ;;  %v490_v6 = vmax.f32 %v916_v49, 0.0  ;;  %v983_v33 = vadd.f32 %v317_v61, %v227_v60  ;;  %v494_v40 = vmax.f32 %v945_v7, 0.0 }
  0x32   : > { %568 = vst [vmem:[%s772_s21 + $0xf0] sm:$0xff] %v477_v10  ;;  %v229_v8 = vld [vmem:[%s756_s15 + $0x1a0] sm:$0xff]  ;;  %v949_v10 = vadd.f32 %v331_v3, %v241_v62  ;;  %v951_v11 = vadd.f32 %v332_v5, %v242_v4  ;;  %v243_v12 = vld [vmem:[%s756_s15 + $0x210] sm:$0xff]  ;;  %v230_v17 = vld [vmem:[%s756_s15 + $0x1a8] sm:$0xff]  ;;  %v995_v41 = vadd.f32 %v318_v2, %v228_v1  ;;  %v495_v49 = vmax.f32 %v958_v16, 0.0 }
  0x33   : > { %569 = vst.msk [vmem:[%s772_s21 + $0xf8] sm:$0xff] %vm538_vm0, %v478_v14  ;;  %v319_v9 = vld [vmem:[%s761_s18 + $0x1a0] sm:$0xff]  ;;  %v333_v13 = vld [vmem:[%s761_s18 + $0x210] sm:$0xff]  ;;  %v244_v14 = vld [vmem:[%s756_s15 + $0x218] sm:$0xff]  ;;  %v496_v57 = vmax.f32 %v970_v24, 0.0  ;;  %v497_v2 = vmax.f32 %v983_v33, 0.0 }
  0x34   : > { %570 = vst [vmem:[%s772_s21 + $0x100] sm:$0xff] %v479_v18  ;;  %v320_v18 = vld [vmem:[%s761_s18 + $0x1a8] sm:$0xff]  ;;  %v962_v19 = vadd.f32 %v333_v13, %v243_v12  ;;  %v334_v20 = vld [vmem:[%s761_s18 + $0x218] sm:$0xff]  ;;  %v245_v21 = vld [vmem:[%s756_s15 + $0x220] sm:$0xff]  ;;  %v1008_v50 = vadd.f32 %v319_v9, %v229_v8  ;;  %v498_v12 = vmax.f32 %v995_v41, 0.0 }
  0x35   : > { %571 = vst.msk [vmem:[%s772_s21 + $0x108] sm:$0xff] %vm538_vm0, %v480_v22  ;;  %v335_v22 = vld [vmem:[%s761_s18 + $0x220] sm:$0xff]  ;;  %v231_v25 = vld [vmem:[%s756_s15 + $0x1b0] sm:$0xff]  ;;  %v974_v27 = vadd.f32 %v334_v20, %v244_v14  ;;  %v246_v29 = vld [vmem:[%s756_s15 + $0x228] sm:$0xff] }
  0x36   : > { %572 = vst [vmem:[%s772_s21 + $0x110] sm:$0xff] %v481_v26  ;;  %v321_v26 = vld [vmem:[%s761_s18 + $0x1b0] sm:$0xff]  ;;  %v976_v28 = vadd.f32 %v335_v22, %v245_v21  ;;  %v322_v35 = vld [vmem:[%s761_s18 + $0x1b8] sm:$0xff]  ;;  %v233_v42 = vld [vmem:[%s756_s15 + $0x1c0] sm:$0xff]  ;;  %v499_v22 = vmax.f32 %v1008_v50, 0.0 }
  0x37   : > { %573 = vst.msk [vmem:[%s772_s21 + $0x118] sm:$0xff] %vm538_vm0, %v482_v30  ;;  %v336_v30 = vld [vmem:[%s761_s18 + $0x228] sm:$0xff]  ;;  %v247_v31 = vld [vmem:[%s756_s15 + $0x230] sm:$0xff]  ;;  %v338_v39 = vld [vmem:[%s761_s18 + $0x238] sm:$0xff]  ;;  %v1033_v3 = vadd.f32 %v321_v26, %v231_v25 }
  0x38   : > { %574 = vst [vmem:[%s772_s21 + $0x120] sm:$0xff] %v483_v34  ;;  %v232_v34 = vld [vmem:[%s756_s15 + $0x1b8] sm:$0xff]  ;;  %v987_v36 = vadd.f32 %v336_v30, %v246_v29  ;;  %v337_v37 = vld [vmem:[%s761_s18 + $0x230] sm:$0xff]  ;;  %v249_v46 = vld [vmem:[%s756_s15 + $0x240] sm:$0xff] }
  0x39   : > { %575 = vst.msk [vmem:[%s772_s21 + $0x128] sm:$0xff] %vm538_vm0, %v484_v38  ;;  %v248_v38 = vld [vmem:[%s756_s15 + $0x238] sm:$0xff]  ;;  %v999_v44 = vadd.f32 %v337_v37, %v247_v31  ;;  %v339_v47 = vld [vmem:[%s761_s18 + $0x240] sm:$0xff]  ;;  %v234_v51 = vld [vmem:[%s756_s15 + $0x1c8] sm:$0xff]  ;;  %v1045_v13 = vadd.f32 %v322_v35, %v232_v34 }
  0x3a   : > { %576 = vst [vmem:[%s772_s21 + $0x130] sm:$0xff] %v485_v43  ;;  %v323_v43 = vld [vmem:[%s761_s18 + $0x1c0] sm:$0xff]  ;;  %v1001_v45 = vadd.f32 %v338_v39, %v248_v38  ;;  %v324_v52 = vld [vmem:[%s761_s18 + $0x1c8] sm:$0xff]  ;;  %v251_v55 = vld [vmem:[%s756_s15 + $0x250] sm:$0xff] }
  0x3b   : > { %577 = vst.msk [vmem:[%s772_s21 + $0x138] sm:$0xff] %vm538_vm0, %v486_v48  ;;  %v250_v48 = vld [vmem:[%s756_s15 + $0x248] sm:$0xff]  ;;  %v341_v56 = vld [vmem:[%s761_s18 + $0x250] sm:$0xff]  ;;  %v342_v0 = vld [vmem:[%s761_s18 + $0x258] sm:$0xff]  ;;  %v414_v33 = vadd.f32 %v324_v52, %v234_v51  ;;  %v502_v52 = vmax.f32 %v1045_v13, 0.0 }
  0x3c   : > { %578 = vst [vmem:[%s772_s21 + $0x140] sm:$0xff] %v487_v53  ;;  %v1012_v53 = vadd.f32 %v339_v47, %v249_v46  ;;  %v340_v54 = vld [vmem:[%s761_s18 + $0x248] sm:$0xff]  ;;  %v235_v59 = vld [vmem:[%s756_s15 + $0x1d0] sm:$0xff]  ;;  %v1026_v62 = vadd.f32 %v341_v56, %v251_v55  ;;  %v253_v1 = vld [vmem:[%s756_s15 + $0x260] sm:$0xff] }
  0x3d   : > { %579 = vst.msk [vmem:[%s772_s21 + $0x148] sm:$0xff] %vm538_vm0, %v488_v58  ;;  %v1020_v58 = vadd.f32 %v320_v18, %v230_v17  ;;  %v325_v60 = vld [vmem:[%s761_s18 + $0x1d0] sm:$0xff]  ;;  %v1024_v61 = vadd.f32 %v340_v54, %v250_v48  ;;  %v236_v4 = vld [vmem:[%s756_s15 + $0x1d8] sm:$0xff]  ;;  %v343_v7 = vld [vmem:[%s761_s18 + $0x260] sm:$0xff] }
  0x3e   : > { %580 = vst [vmem:[%s772_s21 + $0x150] sm:$0xff] %v489_v63  ;;  %v252_v63 = vld [vmem:[%s756_s15 + $0x258] sm:$0xff]  ;;  %v254_v8 = vld [vmem:[%s756_s15 + $0x268] sm:$0xff]  ;;  %v237_v14 = vld [vmem:[%s756_s15 + $0x1e0] sm:$0xff]  ;;  %v1049_v16 = vadd.f32 %v343_v7, %v253_v1 }
  0x3f   : > { %581 = vst.msk [vmem:[%s772_s21 + $0x158] sm:$0xff] %vm538_vm0, %v490_v6  ;;  %v326_v5 = vld [vmem:[%s761_s18 + $0x1d8] sm:$0xff]  ;;  %v1037_v6 = vadd.f32 %v342_v0, %v252_v63  ;;  %v344_v9 = vld [vmem:[%s761_s18 + $0x268] sm:$0xff]  ;;  %v255_v18 = vld [vmem:[%s756_s15 + $0x270] sm:$0xff] }
  0x40   : > { %582 = vst [vmem:[%s772_s21 + $0x160] sm:$0xff] %v491_v15  ;;  %v327_v15 = vld [vmem:[%s761_s18 + $0x1e0] sm:$0xff]  ;;  %v1051_v17 = vadd.f32 %v344_v9, %v254_v8  ;;  %v345_v20 = vld [vmem:[%s761_s18 + $0x270] sm:$0xff]  ;;  %v256_v21 = vld [vmem:[%s756_s15 + $0x278] sm:$0xff]  ;;  %v416_v54 = vadd.f32 %v326_v5, %v236_v4  ;;  %v504_v4 = vmax.f32 %v414_v33, 0.0 }
  0x41   : > { %583 = vst.msk [vmem:[%s772_s21 + $0x168] sm:$0xff] %vm538_vm0, %v492_v23  ;;  %v413_v23 = vadd.f32 %v323_v43, %v233_v42  ;;  %v238_v24 = vld [vmem:[%s756_s15 + $0x1e8] sm:$0xff]  ;;  %v1060_v26 = vadd.f32 %v345_v20, %v255_v18  ;;  %v346_v29 = vld [vmem:[%s761_s18 + $0x278] sm:$0xff]  ;;  %v257_v30 = vld [vmem:[%s756_s15 + $0x280] sm:$0xff]  ;;  %v501_v42 = vmax.f32 %v1033_v3, 0.0  ;;  %v415_v43 = vadd.f32 %v325_v60, %v235_v59 }
  0x42   : > { %584 = vst [vmem:[%s772_s21 + $0x170] sm:$0xff] %v493_v32  ;;  %v328_v25 = vld [vmem:[%s761_s18 + $0x1e8] sm:$0xff]  ;;  %v347_v31 = vld [vmem:[%s761_s18 + $0x280] sm:$0xff]  ;;  %v500_v32 = vmax.f32 %v1020_v58, 0.0  ;;  %v239_v34 = vld [vmem:[%s756_s15 + $0x1f0] sm:$0xff]  ;;  %v1070_v37 = vadd.f32 %v346_v29, %v256_v21  ;;  %v417_v63 = vadd.f32 %v327_v15, %v237_v14 }
  0x43   : > { %585 = vst.msk [vmem:[%s772_s21 + $0x178] sm:$0xff] %vm538_vm0, %v494_v40  ;;  %v329_v35 = vld [vmem:[%s761_s18 + $0x1f0] sm:$0xff]  ;;  %v1072_v38 = vadd.f32 %v347_v31, %v257_v30  ;;  %v258_v39 = vld [vmem:[%s756_s15 + $0x288] sm:$0xff]  ;;  %v240_v46 = vld [vmem:[%s756_s15 + $0x1f8] sm:$0xff]  ;;  %v503_v60 = vmax.f32 %v413_v23, 0.0  ;;  %v418_v5 = vadd.f32 %v328_v25, %v238_v24  ;;  %v505_v14 = vmax.f32 %v415_v43, 0.0 }
  0x44   : > { %586 = vst [vmem:[%s772_s21 + $0x180] sm:$0xff] %v495_v49  ;;  %v348_v40 = vld [vmem:[%s761_s18 + $0x288] sm:$0xff]  ;;  %v259_v41 = vld [vmem:[%s756_s15 + $0x290] sm:$0xff]  ;;  %v330_v47 = vld [vmem:[%s761_s18 + $0x1f8] sm:$0xff]  ;;  %v419_v15 = vadd.f32 %v329_v35, %v239_v34  ;;  %v506_v23 = vmax.f32 %v416_v54, 0.0  ;;  %v507_v30 = vmax.f32 %v417_v63, 0.0 }
  0x45   : > { %587 = vst.msk [vmem:[%s772_s21 + $0x188] sm:$0xff] %vm538_vm0, %v496_v57  ;;  %v1081_v48 = vadd.f32 %v348_v40, %v258_v39  ;;  %v349_v49 = vld [vmem:[%s761_s18 + $0x290] sm:$0xff]  ;;  %v260_v50 = vld [vmem:[%s756_s15 + $0x298] sm:$0xff]  ;;  %v261_v57 = vld [vmem:[%s756_s15 + $0x2a0] sm:$0xff]  ;;  %v420_v24 = vadd.f32 %v330_v47, %v240_v46  ;;  %v508_v31 = vmax.f32 %v418_v5, 0.0  ;;  %v511_v34 = vmax.f32 %v949_v10, 0.0 }
  0x46   : > { %588 = vst [vmem:[%s772_s21 + $0x190] sm:$0xff] %v497_v2  ;;  %v350_v51 = vld [vmem:[%s761_s18 + $0x298] sm:$0xff]  ;;  %v1089_v55 = vadd.f32 %v349_v49, %v259_v41  ;;  %v351_v58 = vld [vmem:[%s761_s18 + $0x2a0] sm:$0xff]  ;;  %v262_v59 = vld [vmem:[%s756_s15 + $0x2a8] sm:$0xff]  ;;  %v512_v35 = vmax.f32 %v951_v11, 0.0  ;;  %v513_v39 = vmax.f32 %v962_v19, 0.0 }
  0x47   : > { %589 = vst.msk [vmem:[%s772_s21 + $0x198] sm:$0xff] %vm538_vm0, %v498_v12  ;;  %v1091_v56 = vadd.f32 %v350_v51, %v260_v50  ;;  %v1097_v0 = vadd.f32 %v351_v58, %v261_v57  ;;  %v352_v1 = vld [vmem:[%s761_s18 + $0x2a8] sm:$0xff]  ;;  %v263_v2 = vld [vmem:[%s756_s15 + $0x2b0] sm:$0xff]  ;;  %v264_v9 = vld [vmem:[%s756_s15 + $0x2b8] sm:$0xff]  ;;  %v510_v33 = vmax.f32 %v420_v24, 0.0  ;;  %v514_v40 = vmax.f32 %v974_v27, 0.0 }
  0x48   : > { %590 = vst [vmem:[%s772_s21 + $0x1a0] sm:$0xff] %v499_v22  ;;  %v353_v3 = vld [vmem:[%s761_s18 + $0x2b0] sm:$0xff]  ;;  %v1104_v7 = vadd.f32 %v352_v1, %v262_v59  ;;  %v354_v12 = vld [vmem:[%s761_s18 + $0x2b8] sm:$0xff]  ;;  %v265_v13 = vld [vmem:[%s756_s15 + $0x2c0] sm:$0xff]  ;;  %v515_v41 = vmax.f32 %v976_v28, 0.0  ;;  %v516_v10 = vmax.f32 %v987_v36, 0.0 }
  0x49   : > { %591 = vst.msk [vmem:[%s772_s21 + $0x1a8] sm:$0xff] %vm538_vm0, %v500_v32  ;;  %v1106_v8 = vadd.f32 %v353_v3, %v263_v2  ;;  %v1112_v18 = vadd.f32 %v354_v12, %v264_v9  ;;  %v355_v20 = vld [vmem:[%s761_s18 + $0x2c0] sm:$0xff]  ;;  %v266_v21 = vld [vmem:[%s756_s15 + $0x2c8] sm:$0xff]  ;;  %v509_v32 = vmax.f32 %v419_v15, 0.0  ;;  %v517_v11 = vmax.f32 %v999_v44, 0.0 }
  0x4a   : > { %592 = vst [vmem:[%s772_s21 + $0x1b0] sm:$0xff] %v501_v42  ;;  %v356_v22 = vld [vmem:[%s761_s18 + $0x2c8] sm:$0xff]  ;;  %v1119_v25 = vadd.f32 %v355_v20, %v265_v13  ;;  %v518_v19 = vmax.f32 %v1001_v45, 0.0  ;;  %v519_v27 = vmax.f32 %v1012_v53, 0.0  ;;  %v520_v28 = vmax.f32 %v1024_v61, 0.0 }
  0x4b   : > { %593 = vst.msk [vmem:[%s772_s21 + $0x1b8] sm:$0xff] %vm538_vm0, %v502_v52  ;;  %v1121_v29 = vadd.f32 %v356_v22, %v266_v21  ;;  %v521_v36 = vmax.f32 %v1026_v62, 0.0  ;;  %v522_v44 = vmax.f32 %v1037_v6, 0.0  ;;  %v523_v45 = vmax.f32 %v1049_v16, 0.0 }
  0x4c   : > { %594 = vst [vmem:[%s772_s21 + $0x1c0] sm:$0xff] %v503_v60  ;;  %v524_v53 = vmax.f32 %v1051_v17, 0.0  ;;  %v525_v61 = vmax.f32 %v1060_v26, 0.0  ;;  %v526_v62 = vmax.f32 %v1070_v37, 0.0  ;;  %v527_v6 = vmax.f32 %v1072_v38, 0.0 }
  0x4d   : > { %595 = vst.msk [vmem:[%s772_s21 + $0x1c8] sm:$0xff] %vm538_vm0, %v504_v4  ;;  %v528_v16 = vmax.f32 %v1081_v48, 0.0  ;;  %v529_v17 = vmax.f32 %v1089_v55, 0.0  ;;  %v530_v26 = vmax.f32 %v1091_v56, 0.0  ;;  %v531_v37 = vmax.f32 %v1097_v0, 0.0 }
  0x4e   : > { %596 = vst [vmem:[%s772_s21 + $0x1d0] sm:$0xff] %v505_v14  ;;  %v532_v38 = vmax.f32 %v1104_v7, 0.0  ;;  %v533_v42 = vmax.f32 %v1106_v8, 0.0  ;;  %v534_v43 = vmax.f32 %v1112_v18, 0.0  ;;  %v535_v46 = vmax.f32 %v1119_v25, 0.0 }
  0x4f   : > { %597 = vst.msk [vmem:[%s772_s21 + $0x1d8] sm:$0xff] %vm538_vm0, %v506_v23  ;;  %v536_v47 = vmax.f32 %v1121_v29, 0.0 }
  0x50   : > { %598 = vst [vmem:[%s772_s21 + $0x1e0] sm:$0xff] %v507_v30 }
  0x51   : > { %599 = vst.msk [vmem:[%s772_s21 + $0x1e8] sm:$0xff] %vm538_vm0, %v508_v31 }
  0x52   : > { %600 = vst [vmem:[%s772_s21 + $0x1f0] sm:$0xff] %v509_v32 }
  0x53   : > { %601 = vst.msk [vmem:[%s772_s21 + $0x1f8] sm:$0xff] %vm538_vm0, %v510_v33 }
  0x54   : > { %602 = vst [vmem:[%s772_s21 + $0x200] sm:$0xff] %v511_v34 }
  0x55   : > { %603 = vst.msk [vmem:[%s772_s21 + $0x208] sm:$0xff] %vm538_vm0, %v512_v35 }
  0x56   : > { %604 = vst [vmem:[%s772_s21 + $0x210] sm:$0xff] %v513_v39 }
  0x57   : > { %605 = vst.msk [vmem:[%s772_s21 + $0x218] sm:$0xff] %vm538_vm0, %v514_v40 }
  0x58   : > { %606 = vst [vmem:[%s772_s21 + $0x220] sm:$0xff] %v515_v41 }
  0x59   : > { %607 = vst.msk [vmem:[%s772_s21 + $0x228] sm:$0xff] %vm538_vm0, %v516_v10 }
  0x5a   : > { %608 = vst [vmem:[%s772_s21 + $0x230] sm:$0xff] %v517_v11 }
  0x5b   : > { %609 = vst.msk [vmem:[%s772_s21 + $0x238] sm:$0xff] %vm538_vm0, %v518_v19 }
  0x5c   : > { %610 = vst [vmem:[%s772_s21 + $0x240] sm:$0xff] %v519_v27 }
  0x5d   : > { %611 = vst.msk [vmem:[%s772_s21 + $0x248] sm:$0xff] %vm538_vm0, %v520_v28 }
  0x5e   : > { %612 = vst [vmem:[%s772_s21 + $0x250] sm:$0xff] %v521_v36 }
  0x5f   : > { %613 = vst.msk [vmem:[%s772_s21 + $0x258] sm:$0xff] %vm538_vm0, %v522_v44 }
  0x60   : > { %614 = vst [vmem:[%s772_s21 + $0x260] sm:$0xff] %v523_v45 }
  0x61   : > { %615 = vst.msk [vmem:[%s772_s21 + $0x268] sm:$0xff] %vm538_vm0, %v524_v53 }
  0x62   : > { %616 = vst [vmem:[%s772_s21 + $0x270] sm:$0xff] %v525_v61 }
  0x63   : > { %617 = vst.msk [vmem:[%s772_s21 + $0x278] sm:$0xff] %vm538_vm0, %v526_v62 }
  0x64   : > { %618 = vst [vmem:[%s772_s21 + $0x280] sm:$0xff] %v527_v6 }
  0x65   : > { %619 = vst.msk [vmem:[%s772_s21 + $0x288] sm:$0xff] %vm538_vm0, %v528_v16 }
  0x66   : > { %620 = vst [vmem:[%s772_s21 + $0x290] sm:$0xff] %v529_v17 }
  0x67   : > { %621 = vst.msk [vmem:[%s772_s21 + $0x298] sm:$0xff] %vm538_vm0, %v530_v26 }
  0x68   : > { %622 = vst [vmem:[%s772_s21 + $0x2a0] sm:$0xff] %v531_v37 }
  0x69   : > { %623 = vst.msk [vmem:[%s772_s21 + $0x2a8] sm:$0xff] %vm538_vm0, %v532_v38 }
  0x6a   : > { %624 = vst [vmem:[%s772_s21 + $0x2b0] sm:$0xff] %v533_v42 }
  0x6b   : > { %625 = vst.msk [vmem:[%s772_s21 + $0x2b8] sm:$0xff] %vm538_vm0, %v534_v43 }
  0x6c   : > { %626 = vst [vmem:[%s772_s21 + $0x2c0] sm:$0xff] %v535_v46 }
  0x6d   : > { %627 = vst.msk [vmem:[%s772_s21 + $0x2c8] sm:$0xff] %vm538_vm0, %v536_v47 }
  0x6e PF: > { %s12_s9 = sadd.s32 1, %s728_s9  }
  0x6f   : > { %p9_p4 = scmp.ge.s32.totalorder %s12_s9, 4  }
  0x71   :  { %11 = sbr.rel (!%p9_p4) target bundleno = 1 (0x1), region = 61 }

</bundles_post_ra>
